<compile_context>
chip_gen: v7x
topology: tpu7x:2x2x1
jax: 0.10.0
libtpu: 0.0.40
codegen_flags: <defaults>
</compile_context>

<pallas_src>
import functools

import jax
import jax.numpy as jnp
from jax import lax
from jax.experimental import pallas as pl
from jax.experimental.pallas import tpu as pltpu


# 3x3 tap offsets in (dy, dx) order; tap weight = w[dy+1, dx+1]
# (PyTorch cross-correlation with padding=1).
_TAPS = tuple((dy, dx) for dy in (-1, 0, 1) for dx in (-1, 0, 1))


def _softplus(x):
    return jnp.maximum(x, 0.0) + jnp.log(1.0 + jnp.exp(-jnp.abs(x)))


def _sigmoid(x):
    return 1.0 / (1.0 + jnp.exp(-x))


# -----------------------------------------------------------------------------
# pltpu.roll sign-convention probe (resolved once, eagerly, before any jit).
# -----------------------------------------------------------------------------
_ROLL_LIKE_JNP = None


def _roll_like_jnp():
    """True iff pltpu.roll(x, s, axis)[i] == x[(i - s) % n] (jnp.roll style)."""
    global _ROLL_LIKE_JNP
    if _ROLL_LIKE_JNP is not None:
        return _ROLL_LIKE_JNP

    def probe(x_ref, o_ref):
        o_ref[...] = pltpu.roll(x_ref[...], 1, 1)

    with jax.ensure_compile_time_eval():
        x = jnp.arange(8 * 128, dtype=jnp.float32).reshape(8, 128)
        y = pl.pallas_call(
            probe, out_shape=jax.ShapeDtypeStruct((8, 128), jnp.float32))(x)
        if bool(jnp.all(y == jnp.roll(x, 1, axis=1))):
            _ROLL_LIKE_JNP = True
        elif bool(jnp.all(y == jnp.roll(x, -1, axis=1))):
            _ROLL_LIKE_JNP = False
        else:
            raise RuntimeError("could not determine pltpu.roll convention")
    return _ROLL_LIKE_JNP


# -----------------------------------------------------------------------------
# Fused kernel: whole Euler loop for ONE batch block (grid axis = batch block).
# Activations are (channels, lanes) with lanes = Bt*H*W (primal only) or
# 2*Bt*H*W (primal | tangent stacked).
# -----------------------------------------------------------------------------
def _ffjord_fused_kernel(z_ref, e_ref,
                         w0_ref, b0_ref, t0_ref,
                         w1_ref, b1_ref, t1_ref,
                         w2_ref, b2_ref, t2_ref,
                         out_ref, dlp_ref,
                         *, H, W, n_steps, roll_like_jnp):
    HW = H * W
    C = z_ref.shape[1]
    Lh = z_ref.shape[2]          # Bt * H * W   (primal lanes)
    L = 2 * Lh                   # primal + tangent stacked on lanes
    dt = 1.0 / n_steps
    mxu_dtype = w0_ref.dtype     # bf16 by default (f32 accumulation)

    # ---- invariant loads, hoisted out of the time loop ----------------------
    z0 = z_ref[0]                                    # (C, Lh) f32
    ee = e_ref[0]                                    # (C, Lh) f32, fixed probe
    w = (w0_ref[...], w1_ref[...], w2_ref[...])      # (9, cout, cin) mxu dtype
    b = (b0_ref[...], b1_ref[...], b2_ref[...])      # (cout, 1) f32
    tm = (t0_ref[...], t1_ref[...], t2_ref[...])     # (cout, Lh) f32

    # ---- boundary masks: HW-periodic, so a single lane-roll of the whole
    # stacked axis is a correct zero-padded spatial shift for every segment ---
    def make_masks(n):
        pos = lax.broadcasted_iota(jnp.int32, (1, n), 1)
        q = pos % HW
        yy = q // W
        xx = q % W
        ms = []
        for dy, dx in _TAPS:
            if dy == 0 and dx == 0:
                ms.append(None)
            else:
                ok = ((yy + dy >= 0) & (yy + dy < H) &
                      (xx + dx >= 0) & (xx + dx < W))
                ms.append(ok.astype(jnp.float32))
        return ms

    masks_h = make_masks(Lh)     # for (cin, Lh) operands
    masks_f = make_masks(L)      # for (cin, L)  stacked operands

    def conv3x3(u, wk, masks):
        # u: (cin, n) f32, wk: (9, cout, cin); returns (cout, n) f32.
        n = u.shape[1]
        acc = None
        for i, (dy, dx) in enumerate(_TAPS):
            off = dy * W + dx
            if off == 0:
                tap = u
            else:
                shift = ((-off) if roll_like_jnp else off) % n
                tap = pltpu.roll(u, shift, 1)             # XLU lane rotation
            if masks[i] is not None:
                tap = tap * masks[i]
            c = jnp.dot(wk[i], tap.astype(mxu_dtype),
                        preferred_element_type=jnp.float32)
            acc = c if acc is None else acc + c
        return acc

    # Layer-0 tangent pre-activation conv0_x(e) is step-invariant: hoist it.
    da0 = conv3x3(ee, w[0], masks_h)                      # (hidden, Lh)

    def step(k, carry):
        z, jsum = carry
        t = k.astype(jnp.float32) * dt
        # layer 0: primal conv + bias + t * time-bias; tangent reuses da0.
        a0 = conv3x3(z, w[0], masks_h) + b[0] + t * tm[0]
        u = jnp.concatenate([_softplus(a0), _sigmoid(a0) * da0], axis=1)
        # layer 1 (stacked primal | tangent on lanes).
        a1 = conv3x3(u, w[1], masks_f)
        a1p = a1[:, :Lh] + b[1] + t * tm[1]
        u = jnp.concatenate([_softplus(a1p), _sigmoid(a1p) * a1[:, Lh:]],
                            axis=1)
        # layer 2: no nonlinearity; primal = dz/dt, tangent = J @ e (exact JVP).
        a2 = conv3x3(u, w[2], masks_f)
        f = a2[:, :Lh] + b[2] + t * tm[2]
        jve = a2[:, Lh:]
        return (z + dt * f, jsum + jve)

    # TODO(synk): sweep fori_loop unroll=2 for the LLO scheduler.
    zT, jsum = lax.fori_loop(0, n_steps, step, (z0, jnp.zeros_like(z0)))

    out_ref[...] = zT.reshape(out_ref.shape)              # lane-dense copy
    # delta_logp = -dt * sum_k e . (J_k e); spatial reduction finishes outside.
    dlp_ref[...] = (-dt * jnp.sum(ee * jsum, axis=0, keepdims=True)
                    ).reshape(dlp_ref.shape)


# -----------------------------------------------------------------------------
# Wrapper: layout plumbing, per-layer weight / time-bias prep, pallas_call.
# -----------------------------------------------------------------------------
def ffjord_cnf_forward(params, x_nchw, noise_e, *, n_steps=4, bt=None,
                       mxu_dtype=jnp.bfloat16):
    """Forward of FfjordCNF: returns dict(out, delta_logp, nelement).

    params: list of 3 (w, b) with w of shape (3, 3, cin+1, cout) in HWIO, the
    first input channel being the concatenated time channel (ConcatConv2d).
    """
    assert len(params) == 3, "fused kernel is specialized to a 3-layer ODEnet"
    B, C, H, W = x_nchw.shape
    HW = H * W
    if bt is None:
        # >=2 'parallel' grid programs keeps both v7x TensorCores busy while
        # still giving single-TC v5e/v6e a wide lane extent per program.
        bt = B // 2 if (B % 2 == 0 and B >= 2) else 1
    assert B % bt == 0
    G = B // bt
    Lh = bt * HW
    L = 2 * Lh
    assert Lh % 128 == 0, "lane-dense layout needs Bt*H*W % 128 == 0"
    # TODO(synk): pad the flattened spatial axis to 128 lanes for shapes where
    # Bt*H*W is not already a multiple of 128.

    roll_like_jnp = _roll_like_jnp()

    def to_blocks(a):            # (B, C, H, W) -> (G, C, Bt*H*W), f32
        a = a.astype(jnp.float32).reshape(G, bt, C, HW)
        return a.transpose(0, 2, 1, 3).reshape(G, C, Lh)

    zb = to_blocks(x_nchw)
    eb = to_blocks(noise_e)

    kernel_args = [zb, eb]
    in_specs = [
        pl.BlockSpec((1, C, Lh), lambda g: (g, 0, 0)),
        pl.BlockSpec((1, C, Lh), lambda g: (g, 0, 0)),
    ]

    ones_pad = jnp.pad(jnp.ones((H, W), jnp.float32), 1)   # zero padding ring
    flops = 0
    transcendentals = 0
    for li, (wfull, bvec) in enumerate(params):
        cin = wfull.shape[2] - 1                 # input channel 0 is time
        cout = wfull.shape[3]
        w_t = wfull[:, :, 0, :].astype(jnp.float32)          # (3, 3, cout)
        w_x = wfull[:, :, 1:, :].astype(jnp.float32)         # (3, 3, cin, cout)
        # per-tap weights (dy, dx) -> (cout, cin), MXU dtype
        w_k = jnp.stack([w_x[dy + 1, dx + 1].T for dy, dx in _TAPS],
                        axis=0).astype(mxu_dtype)            # (9, cout, cin)
        # positional time-bias map: cross-correlation of the zero-padded ones
        # plane with the time-channel weights (what ConcatConv2d's padded time
        # channel contributes per unit t).
        tmap_hw = sum(w_t[ky, kx][None, None, :] *
                      ones_pad[ky:ky + H, kx:kx + W][:, :, None]
                      for ky in range(3) for kx in range(3))  # (H, W, cout)
        tmap = jnp.tile(tmap_hw.reshape(HW, cout).T, (1, bt))  # (cout, Lh)
        b2d = bvec.reshape(cout, 1).astype(jnp.float32)

        kernel_args += [w_k, b2d, tmap]
        in_specs += [
            pl.BlockSpec((9, cout, cin), lambda g: (0, 0, 0)),
            pl.BlockSpec((cout, 1), lambda g: (0, 0)),
            pl.BlockSpec((cout, Lh), lambda g: (0, 0)),
        ]
        # layer 0's tangent conv is hoisted (computed once per program).
        lanes = Lh * (n_steps + 1) if li == 0 else L * n_steps
        flops += G * 2 * cout * (9 * cin) * lanes
        if li < len(params) - 1:
            # softplus = exp + log (2), sigmoid gate = exp (1) per element.
            transcendentals += G * n_steps * cout * Lh * 3

    out_shape = (
        jax.ShapeDtypeStruct((G, C, Lh), jnp.float32),
        jax.ShapeDtypeStruct((G, 1, Lh), jnp.float32),
    )
    out_specs = (
        pl.BlockSpec((1, C, Lh), lambda g: (g, 0, 0)),
        pl.BlockSpec((1, 1, Lh), lambda g: (g, 0, 0)),
    )
    wb_bytes = sum(int(a.size) * a.dtype.itemsize for a in kernel_args[2:])
    io_bytes = (int(zb.size) + int(eb.size)) * 4 + (G * C * Lh + G * Lh) * 4
    bytes_accessed = G * wb_bytes + io_bytes

    kernel = functools.partial(_ffjord_fused_kernel, H=H, W=W,
                               n_steps=n_steps, roll_like_jnp=roll_like_jnp)

    out_blocks, dlp_blocks = pl.pallas_call(
        kernel,
        grid=(G,),
        out_shape=out_shape,
        in_specs=in_specs,
        out_specs=out_specs,
        compiler_params=pltpu.CompilerParams(
            dimension_semantics=("parallel",),
            vmem_limit_bytes=32 * 1024 * 1024,
        ),
        cost_estimate=pl.CostEstimate(
            flops=int(flops),
            transcendentals=int(transcendentals),
            bytes_accessed=int(bytes_accessed),
        ),
    )(*kernel_args)

    z_out = out_blocks.reshape(G, C, bt, HW).transpose(0, 2, 1, 3)
    z_out = z_out.reshape(B, C, H, W).astype(x_nchw.dtype)
    delta_logp = dlp_blocks.reshape(B, HW).sum(axis=1, keepdims=True)
    # TODO(synk): the reference FFJORD uses an adaptive dopri5 solver; this is
    # fixed-step Euler with an exact-JVP Hutchinson divergence estimate, with
    # delta_logp following the odefunc's (dz, -div) sign convention.
    return {
        "out": z_out,
        "delta_logp": delta_logp,
        "nelement": x_nchw.size,
    }


# -----------------------------------------------------------------------------
# Deterministic parameter construction (3 ConcatConv2d layers; channel 0 = t).
# -----------------------------------------------------------------------------
def init_params(key, c_in, hidden):
    dims = [(c_in + 1, hidden), (hidden + 1, hidden), (hidden + 1, c_in)]
    params = []
    for (ci, co) in dims:
        key, kw, kb = jax.random.split(key, 3)
        scale = 1.0 / jnp.sqrt(9.0 * ci)
        w = scale * jax.random.normal(kw, (3, 3, ci, co), jnp.float32)
        b = 0.01 * jax.random.normal(kb, (co,), jnp.float32)
        params.append((w, b))
    return params


# -----------------------------------------------------------------------------
# Independent pure-JAX reference (lax.conv + jax.jvp), same Euler scheme.
# -----------------------------------------------------------------------------
def reference_forward(params, x_nchw, e_nchw, n_steps):
    B = x_nchw.shape[0]
    dt = 1.0 / n_steps
    n_layers = len(params)

    def odefunc(z_nhwc, t):
        h = z_nhwc
        for li, (w, bias) in enumerate(params):
            tchan = jnp.full(h.shape[:3] + (1,), t, h.dtype)
            hin = jnp.concatenate([tchan, h], axis=-1)
            h = lax.conv_general_dilated(
                hin, w, (1, 1), "SAME",
                dimension_numbers=("NHWC", "HWIO", "NHWC"),
                precision=lax.Precision.HIGHEST) + bias
            if li < n_layers - 1:
                h = _softplus(h)
        return h

    z = jnp.transpose(x_nchw, (0, 2, 3, 1)).astype(jnp.float32)
    e = jnp.transpose(e_nchw, (0, 2, 3, 1)).astype(jnp.float32)
    dlp = jnp.zeros((B,), jnp.float32)
    for k in range(n_steps):
        t = k * dt
        f, jve = jax.jvp(lambda zz: odefunc(zz, t), (z,), (e,))
        dlp = dlp - dt * jnp.sum(e * jve, axis=(1, 2, 3))
        z = z + dt * f
    return jnp.transpose(z, (0, 3, 1, 2)), dlp[:, None]


if __name__ == "__main__":
    B, C, H, W = 2, 4, 16, 16
    HIDDEN = 32
    N_STEPS = 4

    key = jax.random.PRNGKey(0)
    kx, ke, kp = jax.random.split(key, 3)
    x = jax.random.normal(kx, (B, C, H, W), jnp.float32)
    # Fixed Rademacher probe for the Hutchinson divergence estimate.
    e = jnp.sign(jax.random.normal(ke, (B, C, H, W), jnp.float32))
    params = init_params(kp, C, HIDDEN)

    _roll_like_jnp()   # resolve pltpu.roll semantics eagerly, before jit

    # f32-MXU variant: checked against the independent lax.conv/jax.jvp ref.
    fwd_f32 = jax.jit(functools.partial(
        ffjord_cnf_forward, n_steps=N_STEPS, mxu_dtype=jnp.float32))
    out = fwd_f32(params, x, e)
    jax.block_until_ready(out["out"])
    jax.block_until_ready(out["delta_logp"])

    z_expect, dlp_expect = reference_forward(params, x, e, N_STEPS)
    assert out["out"].shape == (B, C, H, W)
    assert out["delta_logp"].shape == (B, 1)
    assert int(out["nelement"]) == B * C * H * W
    assert bool(jnp.allclose(out["out"], z_expect, atol=1e-2, rtol=1e-2))
    assert bool(jnp.allclose(out["delta_logp"], dlp_expect,
                             atol=5e-2, rtol=5e-2))

    # Default bf16-MXU variant (v6e/v7x recommendation): smoke + loose check.
    fwd_bf16 = jax.jit(functools.partial(ffjord_cnf_forward, n_steps=N_STEPS))
    out_bf = fwd_bf16(params, x, e)
    jax.block_until_ready(out_bf["out"])
    jax.block_until_ready(out_bf["delta_logp"])
    assert bool(jnp.all(jnp.isfinite(out_bf["out"])))
    assert bool(jnp.all(jnp.isfinite(out_bf["delta_logp"])))
    assert bool(jnp.allclose(out_bf["out"], z_expect, atol=5e-2, rtol=5e-2))

    print("KERNEL_OK")
</pallas_src>

<mosaic_0001>
module attributes {stable_mosaic.version = 11 : i64} {
  func.func @probe(%arg0: memref<8x128xf32, #tpu.memory_space<vmem>>, %arg1: memref<8x128xf32, #tpu.memory_space<vmem>>) attributes {dimension_semantics = [], scalar_prefetch = 0 : i64, scratch_operands = 0 : i64, tpu.core_type = #tpu.core_type<tc>} {
    %c0 = arith.constant 0 : index
    %c0_0 = arith.constant 0 : index
    %0 = vector.load %arg0[%c0, %c0_0] : memref<8x128xf32, #tpu.memory_space<vmem>>, vector<8x128xf32>
    %c1_i32 = arith.constant 1 : i32
    %1 = tpu.dynamic_rotate %0 by %c1_i32 dim 1 : vector<8x128xf32>, i32 -> vector<8x128xf32>
    %c0_1 = arith.constant 0 : index
    %c0_2 = arith.constant 0 : index
    %2 = vector.load %arg1[%c0_1, %c0_2] : memref<8x128xf32, #tpu.memory_space<vmem>>, vector<8x128xf32>
    tpu.vector_store %arg1[%c0_1, %c0_2], %1 {strides = array<i32>} : memref<8x128xf32, #tpu.memory_space<vmem>>, vector<8x128xf32>,
    return
  }
}

</mosaic_0001>

<bundles_post_ra>
// kernel: tpu_custom_call.1
= control target key start
LH: loop header
LB: loop body
LE: loop exit
PB: predicated region body
PF: predicated region fallthrough
CT: control target
= control target key end

     0   :  { %6 = vsyncpa [#allocation3], 0  ;;  %s128_s0 = inlined_call_operand.hbm [shape: f32[8,128], index: 0, kind: input, shape index: {}]   ;;  %s129_s1 = inlined_call_operand.hbm [shape: f32[8,128], index: 1, kind: output, shape index: {}]  }
   0x1   :  { %7 = vsyncpa [#allocation4], 0  ;;  %s91_s6 = smov [#allocation2]   ;;  %s43_s10 = scalar_lea.hbm %s128_s0, 128 }
   0x2   :  { %s14_s7 = sshll.u32 %s91_s6, 4  ;;  %p44_p0 = scmp.ne.s32.totalorder %s128_s0, %s43_s10  ;;  %s15_s7 = int_to_ptr.vmem [resolvable:$true] %s14_s7 }
   0x3   :  { %p47_p1 = scmp.lt.u32.totalorder %s43_s10, %s128_s0 }
   0x5   :  { %p49_p2 = pnand %p47_p1, %p44_p0 }
   0x7   :  { %52 = shalt.err (!%p49_p2)
}
   0x8   :  { %s53_s15 = scalar_lea.vmem %s15_s7, 128  ;;  %p58_p4 = scmp.lt.s32.totalorder %s15_s7, %s15_s7 }
   0x9   :  { %p54_p3 = scmp.ne.s32.totalorder %s15_s7, %s53_s15  ;;  %p59_p5 = scmp.lt.s32.totalorder %s53_s15, %s53_s15 }
   0xb   :  { %p60_p6 = por %p59_p5, %p58_p4 }
   0xd   :  { %p61_p7 = pnand %p60_p6, %p54_p3 }
   0xf   :  { %64 = shalt.err (!%p61_p7)
}
  0x10   :  { %17 = dma.hbm_to_vmem [thread:$0]  %s128_s0, 128, %s15_s7, [#allocation3]  }
  0x11   :  { %87 = dma.done.wait [#allocation3], 128  }
  0x12   :  { %88 = vsyncadd [#allocation3], 4294967168  ;;  %v21_v0 = vld [vmem:[#allocation2] sm:$0xff]  ;;  %s92_s18 = smov 1   ;;  %s93_s19 = smov [#allocation5]  }
  0x13   :  { %22 = vrot.lane.b32.xlu0 %v21_v0, %s92_s18  ;;  %s31_s20 = sshll.u32 %s93_s19, 4  ;;  %s32_s20 = int_to_ptr.vmem [resolvable:$true] %s31_s20 }
  0x14   :  { %s65_s21 = scalar_lea.vmem %s32_s20, 128  ;;  %p70_p9 = scmp.lt.s32.totalorder %s32_s20, %s32_s20 }
  0x15   :  { %p66_p8 = scmp.ne.s32.totalorder %s32_s20, %s65_s21  ;;  %p71_p10 = scmp.lt.s32.totalorder %s65_s21, %s65_s21 }
  0x17   :  { %p72_p11 = por %p71_p10, %p70_p9 }
  0x19   :  { %p73_p12 = pnand %p72_p11, %p66_p8 }
  0x85   :  { %v23_v1 = vpop.permute.xlu0 %22 }
  0x86   :  { %24 = vst [vmem:[#allocation5] sm:$0xff] %v23_v1 }
  0x87   :  { %76 = shalt.err (!%p73_p12)
}
  0x88   :  { %s77_s0 = scalar_lea.hbm %s129_s1, 128 }
  0x89   :  { %p78_p13 = scmp.ne.s32.totalorder %s129_s1, %s77_s0  ;;  %p81_p0 = scmp.lt.u32.totalorder %s77_s0, %s129_s1 }
  0x8b   :  { %p83_p1 = pnand %p81_p0, %p78_p13 }
  0x8d   :  { %86 = shalt.err (!%p83_p1)
}
  0x8e   :  { %34 = dma.vmem_to_hbm [thread:$0]  %s32_s20, 128, %s129_s1, [#allocation4]  }
  0x8f   :  { %89 = dma.done.wait [#allocation4], 128  }
  0x90   :  { %90 = vsyncadd [#allocation4], 4294967168 }
  0x91   :  { %38 = vsyncpa [#allocation3], 1 }
  0x92   :  { %39 = vsyncpa [#allocation4], 1 }

</bundles_post_ra>
